<compile_context>
chip_gen: v7x
topology: tpu7x:2x2x1
jax: 0.10.0
libtpu: 0.0.40
codegen_flags: <defaults>
</compile_context>

<pallas_src>
import functools

import jax
import jax.numpy as jnp
from jax.experimental import pallas as pl
from jax.experimental.pallas import tpu as pltpu


def _round_up(x, m):
    return (x + m - 1) // m * m


def _pick_tile(size, candidates):
    for c in candidates:
        if size % c == 0:
            return c
    return size


def _pick_row_tile(m):
    if m >= 1024:
        tm = 512
    elif m >= 256:
        tm = 256
    else:
        tm = _round_up(m, 8)
    return tm, _round_up(m, tm)


# ----------------------------------------------------------------------------
# Fused matmul + BN scale/shift + (optional residual) + activation kernel
# ----------------------------------------------------------------------------
def _fused_matmul_kernel(x_ref, w_ref, scale_ref, shift_ref, *rest, act, has_res):
    if has_res:
        res_ref, o_ref, acc_ref = rest
    else:
        o_ref, acc_ref = rest

    k = pl.program_id(2)

    @pl.when(k == 0)
    def _():
        acc_ref[...] = jnp.zeros_like(acc_ref)

    acc_ref[...] += jnp.dot(x_ref[...], w_ref[...],
                            preferred_element_type=jnp.float32)

    @pl.when(k == pl.num_programs(2) - 1)
    def _():
        y = acc_ref[...] * scale_ref[...] + shift_ref[...]
        if has_res:
            y = y + res_ref[...].astype(jnp.float32)
        if act == "relu":
            y = jnp.maximum(y, 0.0)
        elif act == "leaky":
            y = jnp.where(y > 0.0, y, 0.1 * y)
        o_ref[...] = y.astype(o_ref.dtype)


@functools.partial(jax.jit, static_argnames=("act", "out_dtype"))
def fused_matmul(x, w, scale, shift, residual=None, *, act="none",
                 out_dtype=jnp.bfloat16):
    """x: (M, K), w: (K, C), scale/shift: (C,) f32 -> (M, round_up(C,128)).

    Output rows are sliced back to M; channels stay zero-padded to a 128 multiple
    so downstream kernels get lane-dense tensors (the padding is exactly zero).
    """
    m, k = x.shape
    k2, c = w.shape
    assert k == k2

    tm, mp = _pick_row_tile(m)
    cp = _round_up(c, 128)
    tn = _pick_tile(cp, (512, 256, 128))
    kp = _round_up(k, 128)
    tk = _pick_tile(kp, (512, 384, 256, 128))

    xp = x
    if (mp, kp) != (m, k):
        xp = jnp.pad(x, ((0, mp - m), (0, kp - k)))
    xp = xp.astype(jnp.bfloat16)

    wp = w
    if (kp, cp) != (k, c):
        wp = jnp.pad(w, ((0, kp - k), (0, cp - c)))
    wp = wp.astype(jnp.bfloat16)

    sp = jnp.pad(scale.astype(jnp.float32), (0, cp - c)).reshape(1, cp)
    bp = jnp.pad(shift.astype(jnp.float32), (0, cp - c)).reshape(1, cp)

    has_res = residual is not None
    inputs = [xp, wp, sp, bp]
    in_specs = [
        pl.BlockSpec((tm, tk), lambda i, j, kk: (i, kk)),
        pl.BlockSpec((tk, tn), lambda i, j, kk: (kk, j)),
        pl.BlockSpec((1, tn), lambda i, j, kk: (0, j)),
        pl.BlockSpec((1, tn), lambda i, j, kk: (0, j)),
    ]
    if has_res:
        rm, rc = residual.shape
        rp = residual
        if (mp, cp) != (rm, rc):
            rp = jnp.pad(residual, ((0, mp - rm), (0, cp - rc)))
        inputs.append(rp.astype(jnp.bfloat16))
        in_specs.append(pl.BlockSpec((tm, tn), lambda i, j, kk: (i, j)))

    out = pl.pallas_call(
        functools.partial(_fused_matmul_kernel, act=act, has_res=has_res),
        out_shape=jax.ShapeDtypeStruct((mp, cp), out_dtype),
        grid_spec=pltpu.PrefetchScalarGridSpec(
            num_scalar_prefetch=0,
            grid=(mp // tm, cp // tn, kp // tk),
            in_specs=in_specs,
            out_specs=pl.BlockSpec((tm, tn), lambda i, j, kk: (i, j)),
            scratch_shapes=[pltpu.VMEM((tm, tn), jnp.float32)],
        ),
        compiler_params=pltpu.CompilerParams(
            dimension_semantics=("parallel", "parallel", "arbitrary"),
            vmem_limit_bytes=48 * 1024 * 1024),
    )(*inputs)

    if mp != m:
        out = out[:m]
    return out  # channels remain padded to cp (zeros)


# ----------------------------------------------------------------------------
# MaxPool 3x3, stride 2, pad 1  (9 slabs fed as separate inputs; row-tiled grid)
# ----------------------------------------------------------------------------
def _max9_kernel(s0, s1, s2, s3, s4, s5, s6, s7, s8, o_ref):
    m = jnp.maximum(s0[...], s1[...])
    for r in (s2, s3, s4, s5, s6, s7, s8):
        m = jnp.maximum(m, r[...])
    o_ref[...] = m


@jax.jit
def maxpool_3x3_s2(x):
    n, h, w, c = x.shape
    ho = (h + 2 - 3) // 2 + 1
    wo = (w + 2 - 3) // 2 + 1
    xp = jnp.pad(x, ((0, 0), (1, 1), (1, 1), (0, 0)), constant_values=-jnp.inf)
    slabs = []
    for dy in range(3):
        for dx in range(3):
            s = jax.lax.slice(
                xp, (0, dy, dx, 0),
                (n, dy + 2 * (ho - 1) + 1, dx + 2 * (wo - 1) + 1, c),
                (1, 2, 2, 1))
            slabs.append(s.reshape(n * ho * wo, c))
    m = n * ho * wo
    bm, mp = _pick_row_tile(m)
    if mp != m:
        slabs = [jnp.pad(s, ((0, mp - m), (0, 0))) for s in slabs]

    out = pl.pallas_call(
        _max9_kernel,
        out_shape=jax.ShapeDtypeStruct((mp, c), x.dtype),
        grid_spec=pltpu.PrefetchScalarGridSpec(
            num_scalar_prefetch=0,
            grid=(mp // bm,),
            in_specs=[pl.BlockSpec((bm, c), lambda i: (i, 0))] * 9,
            out_specs=pl.BlockSpec((bm, c), lambda i: (i, 0)),
        ),
        compiler_params=pltpu.CompilerParams(
            dimension_semantics=("parallel",),
            vmem_limit_bytes=48 * 1024 * 1024),
    )(*slabs)
    if mp != m:
        out = out[:m]
    return out.reshape(n, ho, wo, c)


# ----------------------------------------------------------------------------
# Global average pool to (1,1) — channel-tiled grid, XLU sum reduction
# ----------------------------------------------------------------------------
def _gap_kernel(x_ref, o_ref, *, inv_hw):
    s = jnp.sum(x_ref[...].astype(jnp.float32), axis=1)
    o_ref[...] = (s * inv_hw).astype(o_ref.dtype)


@jax.jit
def global_avgpool(x):
    n, h, w, c = x.shape
    hw = h * w
    xf = x.reshape(n, hw, c)
    tc = _pick_tile(c, (512, 256, 128))
    return pl.pallas_call(
        functools.partial(_gap_kernel, inv_hw=1.0 / hw),
        out_shape=jax.ShapeDtypeStruct((n, c), jnp.float32),
        grid_spec=pltpu.PrefetchScalarGridSpec(
            num_scalar_prefetch=0,
            grid=(c // tc,),
            in_specs=[pl.BlockSpec((n, hw, tc), lambda j: (0, 0, j))],
            out_specs=pl.BlockSpec((n, tc), lambda j: (0, j)),
        ),
        compiler_params=pltpu.CompilerParams(
            dimension_semantics=("parallel",),
            vmem_limit_bytes=48 * 1024 * 1024),
    )(xf)


# ----------------------------------------------------------------------------
# Conv2d (bias=False) + folded BN + optional residual + activation
# (im2col in bf16 + one fused Pallas matmul; channel-padded activations carried)
# ----------------------------------------------------------------------------
@functools.partial(jax.jit, static_argnames=("stride", "padding", "act"))
def conv2d_bn_act(x, w_oihw, scale, shift, residual=None, *,
                  stride=1, padding=0, act="relu"):
    n, h, w, cin_x = x.shape
    cout, cin_w, kh, kw = w_oihw.shape
    if cin_w < cin_x:  # activation carries zero-padded channels; pad weight to match
        w_oihw = jnp.pad(w_oihw, ((0, 0), (0, cin_x - cin_w), (0, 0), (0, 0)))
    ho = (h + 2 * padding - kh) // stride + 1
    wo = (w + 2 * padding - kw) // stride + 1

    if kh == 1 and kw == 1 and padding == 0:
        xs = x if stride == 1 else x[:, ::stride, ::stride, :]
        xcol = xs.reshape(n * ho * wo, cin_x)
    else:
        xp = jnp.pad(x, ((0, 0), (padding, padding), (padding, padding), (0, 0)))
        patches = []
        for dy in range(kh):
            for dx in range(kw):
                s = jax.lax.slice(
                    xp, (0, dy, dx, 0),
                    (n, dy + stride * (ho - 1) + 1,
                     dx + stride * (wo - 1) + 1, cin_x),
                    (1, stride, stride, 1))
                patches.append(s)
        xcol = jnp.concatenate(patches, axis=-1).reshape(n * ho * wo, kh * kw * cin_x)

    wmat = jnp.transpose(w_oihw, (2, 3, 1, 0)).reshape(kh * kw * cin_x, cout)

    res2d = None
    if residual is not None:
        res2d = residual.reshape(n * ho * wo, residual.shape[-1])

    y = fused_matmul(xcol, wmat, scale, shift, res2d, act=act)
    return y.reshape(n, ho, wo, y.shape[-1])


# ----------------------------------------------------------------------------
# Deterministic parameter construction (ResNet-50 + ClassBlock(2048, 751))
# ----------------------------------------------------------------------------
def _fold_bn(gamma, beta, mean, var, eps=1e-5):
    scale = gamma / jnp.sqrt(var + eps)
    shift = beta - mean * scale
    return scale, shift


class ParamGen:
    def __init__(self, seed=0):
        self.key = jax.random.PRNGKey(seed)

    def _next(self):
        self.key, k = jax.random.split(self.key)
        return k

    def conv(self, cout, cin, kh, kw):
        fan_in = cin * kh * kw
        std = 0.5 * (2.0 / fan_in) ** 0.5
        return std * jax.random.normal(self._next(), (cout, cin, kh, kw), jnp.float32)

    def bn(self, c):
        gamma = 1.0 + 0.1 * jax.random.normal(self._next(), (c,), jnp.float32)
        beta = 0.1 * jax.random.normal(self._next(), (c,), jnp.float32)
        mean = 0.1 * jax.random.normal(self._next(), (c,), jnp.float32)
        var = 1.0 + 0.1 * jax.random.uniform(self._next(), (c,), jnp.float32)
        return _fold_bn(gamma, beta, mean, var)

    def linear(self, fin, fout):
        w = (1.0 / fin) ** 0.5 * jax.random.normal(self._next(), (fin, fout), jnp.float32)
        b = 0.01 * jax.random.normal(self._next(), (fout,), jnp.float32)
        return w, b


LAYER_CFG = [(64, 3, 1), (128, 4, 2), (256, 6, 2), (512, 3, 2)]  # (planes, blocks, stride)


def make_bottleneck_params(pg, inplanes, planes, has_ds):
    p = {
        "conv1": pg.conv(planes, inplanes, 1, 1), "bn1": pg.bn(planes),
        "conv2": pg.conv(planes, planes, 3, 3), "bn2": pg.bn(planes),
        "conv3": pg.conv(planes * 4, planes, 1, 1), "bn3": pg.bn(planes * 4),
    }
    if has_ds:
        p["ds_conv"] = pg.conv(planes * 4, inplanes, 1, 1)
        p["ds_bn"] = pg.bn(planes * 4)
    return p


def make_ft_net_params(class_num=751, seed=0):
    pg = ParamGen(seed)
    params = {"conv1": pg.conv(64, 3, 7, 7), "bn1": pg.bn(64), "layers": []}
    inplanes = 64
    for planes, nblocks, stride in LAYER_CFG:
        blocks = []
        for bi in range(nblocks):
            s = stride if bi == 0 else 1
            has_ds = (bi == 0) and (s != 1 or inplanes != planes * 4)
            blocks.append(make_bottleneck_params(pg, inplanes, planes, has_ds))
            inplanes = planes * 4
        params["layers"].append(blocks)
    # ClassBlock(2048, class_num): Linear(2048,512)+BN1d+LeakyReLU(0.1)+Dropout+Linear
    params["fc1_w"], params["fc1_b"] = pg.linear(2048, 512)
    params["fc1_bn"] = pg.bn(512)
    params["fc2_w"], params["fc2_b"] = pg.linear(512, class_num)
    return params


# ----------------------------------------------------------------------------
# Forward pass
# ----------------------------------------------------------------------------
def bottleneck_forward(x, p, stride):
    out = conv2d_bn_act(x, p["conv1"], *p["bn1"], stride=1, padding=0, act="relu")
    out = conv2d_bn_act(out, p["conv2"], *p["bn2"], stride=stride, padding=1, act="relu")
    if "ds_conv" in p:
        identity = conv2d_bn_act(x, p["ds_conv"], *p["ds_bn"],
                                 stride=stride, padding=0, act="none")
    else:
        identity = x
    # conv3 + BN3 + residual add + ReLU all fused into one matmul epilogue.
    return conv2d_bn_act(out, p["conv3"], *p["bn3"], residual=identity,
                         stride=1, padding=0, act="relu")


def classblock_forward(feat, params):
    scale1, shift1 = params["fc1_bn"]
    # fold the Linear bias through the (eval-mode) BatchNorm1d
    shift = scale1 * params["fc1_b"] + shift1
    h = fused_matmul(feat, params["fc1_w"], scale1, shift, act="leaky")
    # TODO(synk): nn.Dropout(0.5) is identity in eval mode (no Pallas op emitted).
    class_num = params["fc2_w"].shape[1]
    ones = jnp.ones((class_num,), jnp.float32)
    logits = fused_matmul(h, params["fc2_w"], ones, params["fc2_b"],
                          act="none", out_dtype=jnp.float32)
    return logits[:, :class_num]


def ft_net_forward(params, x_nchw):
    x = jnp.transpose(x_nchw, (0, 2, 3, 1)).astype(jnp.bfloat16)  # NCHW -> NHWC bf16
    x = conv2d_bn_act(x, params["conv1"], *params["bn1"],
                      stride=2, padding=3, act="relu")
    x = maxpool_3x3_s2(x)
    for li, (planes, nblocks, stride) in enumerate(LAYER_CFG):
        for bi in range(nblocks):
            s = stride if bi == 0 else 1
            x = bottleneck_forward(x, params["layers"][li][bi], s)
    feat = global_avgpool(x)              # (N, 2048) == torch.squeeze of (N,2048,1,1)
    return classblock_forward(feat, params)


if __name__ == "__main__":
    class_num = 751
    key = jax.random.PRNGKey(0)
    # Small 3-channel images (ResNet-50 needs >=32x32 to survive downsampling).
    x = jax.random.normal(key, (2, 3, 64, 64), jnp.float32)

    params = make_ft_net_params(class_num=class_num, seed=0)
    out = ft_net_forward(params, x)
    out = jax.block_until_ready(out)

    assert out.shape == (2, class_num), out.shape
    assert bool(jnp.all(jnp.isfinite(out)))
    print("KERNEL_OK")
</pallas_src>

<mosaic_0001>
module attributes {stable_mosaic.version = 11 : i64} {
  func.func @_fused_matmul_kernel(%arg0: i32, %arg1: i32, %arg2: i32, %arg3: memref<512x256xbf16, #tpu.memory_space<vmem>>, %arg4: memref<256x128xbf16, #tpu.memory_space<vmem>>, %arg5: memref<1x128xf32, #tpu.memory_space<vmem>>, %arg6: memref<1x128xf32, #tpu.memory_space<vmem>>, %arg7: memref<512x128xbf16, #tpu.memory_space<vmem>>, %arg8: memref<512x128xf32, #tpu.memory_space<vmem>>) attributes {dimension_semantics = [#tpu.dimension_semantics<parallel>, #tpu.dimension_semantics<parallel>, #tpu.dimension_semantics<arbitrary>], iteration_bounds = array<i64: 4, 1, 1>, scalar_prefetch = 0 : i64, scratch_operands = 1 : i64, tpu.core_type = #tpu.core_type<tc>, window_params = [{transform_indices = @transform_0, window_bounds = array<i64: 512, 256>}, {transform_indices = @transform_1, window_bounds = array<i64: 256, 128>}, {transform_indices = @transform_2, window_bounds = array<i64: 1, 128>}, {transform_indices = @transform_3, window_bounds = array<i64: 1, 128>}, {transform_indices = @transform_4, window_bounds = array<i64: 512, 128>}]} {
    %c0_i32 = arith.constant 0 : i32
    %0 = arith.cmpi eq, %arg2, %c0_i32 : i32
    %1 = arith.extui %0 : i1 to i32
    %c0_i32_0 = arith.constant 0 : i32
    %2 = arith.cmpi ne, %1, %c0_i32_0 : i32
    scf.if %2 {
      %cst_10 = arith.constant 0.000000e+00 : f32
      %12 = vector.broadcast %cst_10 : f32 to vector<512x128xf32>
      %c0_11 = arith.constant 0 : index
      %c0_12 = arith.constant 0 : index
      %13 = vector.load %arg8[%c0_11, %c0_12] : memref<512x128xf32, #tpu.memory_space<vmem>>, vector<512x128xf32>
      tpu.vector_store %arg8[%c0_11, %c0_12], %12 {strides = array<i32>} : memref<512x128xf32, #tpu.memory_space<vmem>>, vector<512x128xf32>,
    } else {
    }
    %c0 = arith.constant 0 : index
    %c0_1 = arith.constant 0 : index
    %3 = vector.load %arg8[%c0, %c0_1] : memref<512x128xf32, #tpu.memory_space<vmem>>, vector<512x128xf32>
    %c0_2 = arith.constant 0 : index
    %c0_3 = arith.constant 0 : index
    %4 = vector.load %arg3[%c0_2, %c0_3] : memref<512x256xbf16, #tpu.memory_space<vmem>>, vector<512x256xbf16>
    %c0_4 = arith.constant 0 : index
    %c0_5 = arith.constant 0 : index
    %5 = vector.load %arg4[%c0_4, %c0_5] : memref<256x128xbf16, #tpu.memory_space<vmem>>, vector<256x128xbf16>
    %cst = arith.constant dense<0.000000e+00> : vector<512x128xf32>
    %6 = tpu.matmul %4, %5, %cst {dimension_numbers = #tpu.dot_dimension_numbers<[1], [0], [0], [1], [0, 0, 1, 1], [], []>} : vector<512x256xbf16>, vector<256x128xbf16>, vector<512x128xf32> -> vector<512x128xf32>
    %7 = arith.addf %3, %6 : vector<512x128xf32>
    %c0_6 = arith.constant 0 : index
    %c0_7 = arith.constant 0 : index
    %8 = vector.load %arg8[%c0_6, %c0_7] : memref<512x128xf32, #tpu.memory_space<vmem>>, vector<512x128xf32>
    tpu.vector_store %arg8[%c0_6, %c0_7], %7 {strides = array<i32>} : memref<512x128xf32, #tpu.memory_space<vmem>>, vector<512x128xf32>,
    %c0_i32_8 = arith.constant 0 : i32
    %9 = arith.cmpi eq, %arg2, %c0_i32_8 : i32
    %10 = arith.extui %9 : i1 to i32
    %c0_i32_9 = arith.constant 0 : i32
    %11 = arith.cmpi ne, %10, %c0_i32_9 : i32
    scf.if %11 {
      %c0_10 = arith.constant 0 : index
      %c0_11 = arith.constant 0 : index
      %12 = vector.load %arg8[%c0_10, %c0_11] : memref<512x128xf32, #tpu.memory_space<vmem>>, vector<512x128xf32>
      %c0_12 = arith.constant 0 : index
      %c0_13 = arith.constant 0 : index
      %13 = vector.load %arg5[%c0_12, %c0_13] : memref<1x128xf32, #tpu.memory_space<vmem>>, vector<1x128xf32>
      %14 = vector.broadcast %13 : vector<1x128xf32> to vector<512x128xf32>
      %15 = arith.mulf %12, %14 : vector<512x128xf32>
      %c0_14 = arith.constant 0 : index
      %c0_15 = arith.constant 0 : index
      %16 = vector.load %arg6[%c0_14, %c0_15] : memref<1x128xf32, #tpu.memory_space<vmem>>, vector<1x128xf32>
      %17 = vector.broadcast %16 : vector<1x128xf32> to vector<512x128xf32>
      %18 = arith.addf %15, %17 : vector<512x128xf32>
      %cst_16 = arith.constant 0.000000e+00 : f32
      %19 = vector.broadcast %cst_16 : f32 to vector<512x128xf32>
      %20 = arith.maximumf %18, %19 : vector<512x128xf32>
      %21 = arith.truncf %20 : vector<512x128xf32> to vector<512x128xbf16>
      %c0_17 = arith.constant 0 : index
      %c0_18 = arith.constant 0 : index
      %22 = vector.load %arg7[%c0_17, %c0_18] : memref<512x128xbf16, #tpu.memory_space<vmem>>, vector<512x128xbf16>
      tpu.vector_store %arg7[%c0_17, %c0_18], %21 {strides = array<i32>} : memref<512x128xbf16, #tpu.memory_space<vmem>>, vector<512x128xbf16>,
    } else {
    }
    return
  }
  func.func @transform_0(%arg0: i32, %arg1: i32, %arg2: i32) -> (i32, i32) {
    %c0_i32 = arith.constant 0 : i32
    return %arg0, %arg2 : i32, i32
  }
  func.func @transform_1(%arg0: i32, %arg1: i32, %arg2: i32) -> (i32, i32) {
    %c0_i32 = arith.constant 0 : i32
    return %arg2, %arg1 : i32, i32
  }
  func.func @transform_2(%arg0: i32, %arg1: i32, %arg2: i32) -> (i32, i32) {
    %c0_i32 = arith.constant 0 : i32
    %c0_i32_0 = arith.constant 0 : i32
    return %c0_i32, %arg1 : i32, i32
  }
  func.func @transform_3(%arg0: i32, %arg1: i32, %arg2: i32) -> (i32, i32) {
    %c0_i32 = arith.constant 0 : i32
    %c0_i32_0 = arith.constant 0 : i32
    return %c0_i32, %arg1 : i32, i32
  }
  func.func @transform_4(%arg0: i32, %arg1: i32, %arg2: i32) -> (i32, i32) {
    %c0_i32 = arith.constant 0 : i32
    return %arg0, %arg1 : i32, i32
  }
}

</mosaic_0001>

<bundles_post_ra>
// kernel: fused_matmul.1
= control target key start
LH: loop header
LB: loop body
LE: loop exit
PB: predicated region body
PF: predicated region fallthrough
CT: control target
= control target key end

     0   :  { %9 = vsyncpa [#allocation4], 0  ;;  %s3261_s0 = inlined_call_operand.vmem [shape: bf16[2048,256], index: 0, kind: input, shape index: {}]   ;;  %s3262_s1 = inlined_call_operand.vmem [shape: bf16[256,128], index: 1, kind: input, shape index: {}]   ;;  %s3263_s2 = inlined_call_operand.vmem [shape: f32[1,128], index: 2, kind: input, shape index: {}]   ;;  %s3264_s3 = inlined_call_operand.vmem [shape: f32[1,128], index: 3, kind: input, shape index: {}]   ;;  %s3265_s4 = inlined_call_operand.hbm [shape: bf16[2048,128], index: 4, kind: output, shape index: {}]  }
   0x1   :  { %11 = vsyncpa [#allocation4 + $0x1], 0  ;;  %s2824_s15 = smov 0   ;;  %s2826_s16 = smov 0  }
   0x2   :  { %s2828_s17 = smov 0   ;;  %s2830_s18 = smov 0  }
   0x3   :  { %s2832_s19 = smov 0   ;;  %s2834_s20 = smov 0  }
   0x4 LB: > { %s2093_s21 = sadd.s32 4294967295, %s2793_s20   ;;  %s2094_s22 = sadd.s32 4294967294, %s2793_s20   ;;  %s2793_s20 = sphi %s2834_s20, %s17_s20   ;;  %s2789_s19 = sphi %s2832_s19, %s3272_s19   ;;  %s2785_s18 = sphi %s2830_s18, %s3271_s18   ;;  %s2781_s17 = sphi %s2828_s17, %s3270_s17   ;;  %s2777_s16 = sphi %s2826_s16, %s3269_s16   ;;  %s2773_s15 = sphi %s2824_s15, %s3268_s15  }
   0x5   : > { %s36_s23 = sadd.s32 1, %s2789_s19  ;;  %s153_s24 = sadd.s32 1, %s2781_s17 }
   0x6   : > { %p38_p0 = scmp.ge.s32.totalorder %s36_s23, 4  ;;  %p163_p1 = scmp.ne.s32.totalorder %s2781_s17, %s2777_s16 }
   0x7   : > { %p164_p2 = scmp.eq.s32.totalorder %s2093_s21, 3  ;;  %p169_p3 = scmp.ne.s32.totalorder %s2777_s16, %s2773_s15 }
   0x8   : > { %s3274_s23 = smov (%p38_p0, %s36_s23), 0  ;;  %p170_p5 = scmp.eq.s32.totalorder %s2094_s22, 3 }
   0x9   : > { %p2864_p4 = por %p164_p2, %p163_p1  ;;  %s148_s26 = ssub.s32 %s2789_s19, %s3274_s23 }
   0xa   : > { %p2100_p6 = scmp.ge.s32.totalorder %s2793_s20, 1  ;;  %p151_p7 = scmp.eq.s32.totalorder %s148_s26, 0 }
   0xb   : > { %p2871_p8 = por %p170_p5, %p169_p3  ;;  %p227_p9 = scmp.lt.s32.totalorder %s2793_s20, 5 }
   0xc   : > { %s2877_s28 = scalar_select %p151_p7, %s2781_s17, %s153_s24  }
   0xd   : > { %p228_p10 = pnand %p2100_p6, %p227_p9 }
   0xe   : > { %v2603_v0 = vld [vmem:[%s3262_s1] sm:$0xff] (!%p228_p10)   ;;  %v2795_v1 = vmov (!%p228_p10), 0   ;;  %s2102_s5 = sshll.u32 (!%p228_p10), %s2785_s18, 6  ;;  %v2604_v2 = vld [vmem:[%s3262_s1 + $0x8] sm:$0xff] (!%p228_p10)   ;;  %v2605_v3 = vld [vmem:[%s3262_s1 + $0x10] sm:$0xff] (!%p228_p10)   ;;  %s2321_s21 = sshll.u32 (!%p228_p10), %s2785_s18, 12 }
   0xf   : > { %231 = sbr.rel (%p228_p10) target bundleno = 437 (0x1b5), region = 36  ;;  %945 = vmatprep.subr.bf16.mxu0 (!%p228_p10), %v2795_v1  ;;  %2513 = vmatprep.subr.bf16.mxu1 (!%p228_p10), %v2795_v1  ;;  %p274_p11 = scmp.lt.s32.totalorder (!%p228_p10), %s2102_s5, 255  ;;  %v2606_v4 = vld [vmem:[%s3262_s1 + $0x18] sm:$0xff] (!%p228_p10)   ;;  %v2607_v5 = vld [vmem:[%s3262_s1 + $0x20] sm:$0xff] (!%p228_p10)   ;;  %v2608_v7 = vld [vmem:[%s3262_s1 + $0x28] sm:$0xff] (!%p228_p10)  }
  0x10   : > { %946 = vmatpush1.bf16.msra.mxu0 (!%p228_p10), %v2603_v0  ;;  %2529 = vmatpush1.bf16.msra.mxu1 (!%p228_p10), %v2603_v0  ;;  %v2609_v9 = vld [vmem:[%s3262_s1 + $0x30] sm:$0xff] (!%p228_p10)   ;;  %v2610_v10 = vld [vmem:[%s3262_s1 + $0x38] sm:$0xff] (!%p228_p10)   ;;  %v2611_v11 = vld [vmem:[%s3262_s1 + $0x40] sm:$0xff] (!%p228_p10)   ;;  %s3207_s30 = scalar_lea.hbm (!%p228_p10), %s3265_s4, %s2321_s21  ;;  %s2796_s6 = smov (!%p228_p10), [#allocation3]  }
  0x11   : > { %947 = vmatprep.subr.bf16.mxu0 (!%p228_p10), %v2795_v1  ;;  %2514 = vmatprep.subr.bf16.mxu1 (!%p228_p10), %v2795_v1  ;;  %v2612_v12 = vld [vmem:[%s3262_s1 + $0x48] sm:$0xff] (!%p228_p10)   ;;  %v2613_v13 = vld [vmem:[%s3262_s1 + $0x50] sm:$0xff] (!%p228_p10)   ;;  %v2614_v14 = vld [vmem:[%s3262_s1 + $0x58] sm:$0xff] (!%p228_p10)   ;;  %s2719_s7 = sshll.u32 (!%p228_p10), %s2796_s6, 4  ;;  %s2720_s7 = int_to_ptr.vmem [resolvable:$false] %s2719_s7 }
  0x12   : > { %v2615_v15 = vld [vmem:[%s3262_s1 + $0x60] sm:$0xff] (!%p228_p10)   ;;  %v2616_v16 = vld [vmem:[%s3262_s1 + $0x68] sm:$0xff] (!%p228_p10)   ;;  %v2617_v17 = vld [vmem:[%s3262_s1 + $0x70] sm:$0xff] (!%p228_p10)   ;;  %s2721_s8 = scalar_lea.vmem (!%p228_p10), %s2720_s7, 8192 }
  0x13   : > { %v2618_v18 = vld [vmem:[%s3262_s1 + $0x78] sm:$0xff] (!%p228_p10)  }
  0x14   : > { %948 = vmatpush1.bf16.msra.mxu0 (!%p228_p10), %v2604_v2  ;;  %2530 = vmatpush1.bf16.msra.mxu1 (!%p228_p10), %v2604_v2 }
  0x15   : > { %949 = vmatprep.subr.bf16.mxu0 (!%p228_p10), %v2795_v1  ;;  %2515 = vmatprep.subr.bf16.mxu1 (!%p228_p10), %v2795_v1 }
  0x16   : > { %s3276_s5 = smov (!%p274_p11, %s2102_s5), 255 }
  0x17   : > { %s2256_s12 = sshll.u32 %s3276_s5, 3 }
  0x18   : > { %950 = vmatpush1.bf16.msra.mxu0 %v2605_v3  ;;  %2531 = vmatpush1.bf16.msra.mxu1 %v2605_v3  ;;  %s2906_s24 = scalar_lea.vmem %s3261_s0, %s2256_s12 }
  0x19   : > { %951 = vmatprep.subr.bf16.mxu0 %v2795_v1  ;;  %2516 = vmatprep.subr.bf16.mxu1 %v2795_v1  ;;  %v2621_v6 = vld [vmem:[%s2906_s24 + $0x4] ss:$8 sps:$4 sm:$0xff]   ;;  %v2619_v19 = vld [vmem:[%s2906_s24] ss:$8 sps:$4 sm:$0xff]   ;;  %v2625_v21 = vld [vmem:[%s2906_s24 + $0x14] ss:$8 sps:$4 sm:$0xff]  }
  0x1a   : > { %v2624_v8 = vld [vmem:[%s2906_s24 + $0x104] ss:$8 sps:$4 sm:$0xff]   ;;  %977 = vmatprep.mubr.bf16.mxu0 %v2621_v6  ;;  %v2622_v20 = vld [vmem:[%s2906_s24 + $0x100] ss:$8 sps:$4 sm:$0xff]   ;;  %v2627_v22 = vld [vmem:[%s2906_s24 + $0x114] ss:$8 sps:$4 sm:$0xff]  }
  0x1b   : > { %1105 = vmatprep.mubr.bf16.mxu1 %v2624_v8  ;;  %v2629_v23 = vld [vmem:[%s2906_s24 + $0x10] ss:$8 sps:$4 sm:$0xff]   ;;  %v2631_v25 = vld [vmem:[%s2906_s24 + $0x24] ss:$8 sps:$4 sm:$0xff]   ;;  %v2635_v27 = vld [vmem:[%s2906_s24 + $0x20] ss:$8 sps:$4 sm:$0xff]  }
  0x1c   : > { %952 = vmatpush1.bf16.msra.mxu0 %v2606_v4  ;;  %2532 = vmatpush1.bf16.msra.mxu1 %v2606_v4  ;;  %v2630_v24 = vld [vmem:[%s2906_s24 + $0x110] ss:$8 sps:$4 sm:$0xff]   ;;  %v2633_v26 = vld [vmem:[%s2906_s24 + $0x124] ss:$8 sps:$4 sm:$0xff]   ;;  %v2636_v28 = vld [vmem:[%s2906_s24 + $0x120] ss:$8 sps:$4 sm:$0xff]  }
  0x1d   : > { %953 = vmatprep.subr.bf16.mxu0 %v2795_v1  ;;  %2517 = vmatprep.subr.bf16.mxu1 %v2795_v1  ;;  %v2637_v29 = vld [vmem:[%s2906_s24 + $0x34] ss:$8 sps:$4 sm:$0xff]   ;;  %v2641_v31 = vld [vmem:[%s2906_s24 + $0x30] ss:$8 sps:$4 sm:$0xff]   ;;  %v2643_v33 = vld [vmem:[%s2906_s24 + $0x44] ss:$8 sps:$4 sm:$0xff]  }
  0x1e   : > { %v2639_v30 = vld [vmem:[%s2906_s24 + $0x134] ss:$8 sps:$4 sm:$0xff]   ;;  %v2642_v32 = vld [vmem:[%s2906_s24 + $0x130] ss:$8 sps:$4 sm:$0xff]   ;;  %v2645_v34 = vld [vmem:[%s2906_s24 + $0x144] ss:$8 sps:$4 sm:$0xff]  }
  0x1f   : > { %v2647_v35 = vld [vmem:[%s2906_s24 + $0x40] ss:$8 sps:$4 sm:$0xff]   ;;  %v2649_v37 = vld [vmem:[%s2906_s24 + $0x54] ss:$8 sps:$4 sm:$0xff]   ;;  %v2653_v39 = vld [vmem:[%s2906_s24 + $0x50] ss:$8 sps:$4 sm:$0xff]  }
  0x20   : > { %954 = vmatpush1.bf16.msra.mxu0 %v2607_v5  ;;  %2533 = vmatpush1.bf16.msra.mxu1 %v2607_v5  ;;  %v2648_v36 = vld [vmem:[%s2906_s24 + $0x140] ss:$8 sps:$4 sm:$0xff]   ;;  %v2651_v38 = vld [vmem:[%s2906_s24 + $0x154] ss:$8 sps:$4 sm:$0xff]   ;;  %v2654_v40 = vld [vmem:[%s2906_s24 + $0x150] ss:$8 sps:$4 sm:$0xff]  }
  0x21   : > { %955 = vmatprep.subr.bf16.mxu0 %v2795_v1  ;;  %2518 = vmatprep.subr.bf16.mxu1 %v2795_v1  ;;  %v2655_v41 = vld [vmem:[%s2906_s24 + $0x64] ss:$8 sps:$4 sm:$0xff]   ;;  %v2659_v43 = vld [vmem:[%s2906_s24 + $0x60] ss:$8 sps:$4 sm:$0xff]   ;;  %v2661_v45 = vld [vmem:[%s2906_s24 + $0x74] ss:$8 sps:$4 sm:$0xff]  }
  0x22   : > { %v2657_v42 = vld [vmem:[%s2906_s24 + $0x164] ss:$8 sps:$4 sm:$0xff]   ;;  %v2660_v44 = vld [vmem:[%s2906_s24 + $0x160] ss:$8 sps:$4 sm:$0xff]   ;;  %v2663_v46 = vld [vmem:[%s2906_s24 + $0x174] ss:$8 sps:$4 sm:$0xff]  }
  0x23   : > { %v2665_v47 = vld [vmem:[%s2906_s24 + $0x70] ss:$8 sps:$4 sm:$0xff]   ;;  %v2667_v49 = vld [vmem:[%s2906_s24 + $0x84] ss:$8 sps:$4 sm:$0xff]   ;;  %v2671_v51 = vld [vmem:[%s2906_s24 + $0x80] ss:$8 sps:$4 sm:$0xff]  }
  0x24   : > { %956 = vmatpush1.bf16.msra.mxu0 %v2608_v7  ;;  %2534 = vmatpush1.bf16.msra.mxu1 %v2608_v7  ;;  %v2666_v48 = vld [vmem:[%s2906_s24 + $0x170] ss:$8 sps:$4 sm:$0xff]   ;;  %v2669_v50 = vld [vmem:[%s2906_s24 + $0x184] ss:$8 sps:$4 sm:$0xff]   ;;  %v2672_v52 = vld [vmem:[%s2906_s24 + $0x180] ss:$8 sps:$4 sm:$0xff]  }
  0x25   : > { %957 = vmatprep.subr.bf16.mxu0 %v2795_v1  ;;  %2519 = vmatprep.subr.bf16.mxu1 %v2795_v1  ;;  %v2673_v53 = vld [vmem:[%s2906_s24 + $0x94] ss:$8 sps:$4 sm:$0xff]   ;;  %v2677_v55 = vld [vmem:[%s2906_s24 + $0x90] ss:$8 sps:$4 sm:$0xff]   ;;  %v2679_v57 = vld [vmem:[%s2906_s24 + $0xa4] ss:$8 sps:$4 sm:$0xff]  }
  0x26   : > { %v2675_v54 = vld [vmem:[%s2906_s24 + $0x194] ss:$8 sps:$4 sm:$0xff]   ;;  %v2678_v56 = vld [vmem:[%s2906_s24 + $0x190] ss:$8 sps:$4 sm:$0xff]   ;;  %v2681_v58 = vld [vmem:[%s2906_s24 + $0x1a4] ss:$8 sps:$4 sm:$0xff]  }
  0x27   : > { %v2683_v59 = vld [vmem:[%s2906_s24 + $0xa0] ss:$8 sps:$4 sm:$0xff]   ;;  %v2685_v61 = vld [vmem:[%s2906_s24 + $0xb4] ss:$8 sps:$4 sm:$0xff]   ;;  %v2689_v63 = vld [vmem:[%s2906_s24 + $0xb0] ss:$8 sps:$4 sm:$0xff]  }
  0x28   : > { %958 = vmatpush1.bf16.msra.mxu0 %v2609_v9  ;;  %2535 = vmatpush1.bf16.msra.mxu1 %v2609_v9  ;;  %v2684_v60 = vld [vmem:[%s2906_s24 + $0x1a0] ss:$8 sps:$4 sm:$0xff]   ;;  %v2687_v62 = vld [vmem:[%s2906_s24 + $0x1b4] ss:$8 sps:$4 sm:$0xff]   ;;  %v2690_v0 = vld [vmem:[%s2906_s24 + $0x1b0] ss:$8 sps:$4 sm:$0xff]  }
  0x29   : > { %959 = vmatprep.subr.bf16.mxu0 %v2795_v1  ;;  %2520 = vmatprep.subr.bf16.mxu1 %v2795_v1  ;;  %v2693_v2 = vld [vmem:[%s2906_s24 + $0x1c4] ss:$8 sps:$4 sm:$0xff]   ;;  %v2695_v3 = vld [vmem:[%s2906_s24 + $0xc0] ss:$8 sps:$4 sm:$0xff]   ;;  %v2697_v5 = vld [vmem:[%s2906_s24 + $0xd4] ss:$8 sps:$4 sm:$0xff]  }
  0x2a   : > { %v2696_v4 = vld [vmem:[%s2906_s24 + $0x1c0] ss:$8 sps:$4 sm:$0xff]   ;;  %v2699_v6 = vld [vmem:[%s2906_s24 + $0x1d4] ss:$8 sps:$4 sm:$0xff]   ;;  %v2701_v7 = vld [vmem:[%s2906_s24 + $0xd0] ss:$8 sps:$4 sm:$0xff]  }
  0x2b   : > { %v2702_v8 = vld [vmem:[%s2906_s24 + $0x1d0] ss:$8 sps:$4 sm:$0xff]   ;;  %v2703_v9 = vld [vmem:[%s2906_s24 + $0xe4] ss:$8 sps:$4 sm:$0xff]  }
  0x2c   : > { %960 = vmatpush1.bf16.msra.mxu0 %v2610_v10  ;;  %2536 = vmatpush1.bf16.msra.mxu1 %v2610_v10  ;;  %v2705_v10 = vld [vmem:[%s2906_s24 + $0x1e4] ss:$8 sps:$4 sm:$0xff]  }
  0x2d   : > { %961 = vmatprep.subr.bf16.mxu0 %v2795_v1  ;;  %2521 = vmatprep.subr.bf16.mxu1 %v2795_v1 }
  0x30   : > { %962 = vmatpush1.bf16.msra.mxu0 %v2611_v11  ;;  %2537 = vmatpush1.bf16.msra.mxu1 %v2611_v11  ;;  %v2707_v11 = vld [vmem:[%s2906_s24 + $0xe0] ss:$8 sps:$4 sm:$0xff]  }
  0x31   : > { %963 = vmatprep.subr.bf16.mxu0 %v2795_v1  ;;  %2522 = vmatprep.subr.bf16.mxu1 %v2795_v1 }
  0x34   : > { %964 = vmatpush1.bf16.msra.mxu0 %v2612_v12  ;;  %2538 = vmatpush1.bf16.msra.mxu1 %v2612_v12  ;;  %v2708_v12 = vld [vmem:[%s2906_s24 + $0x1e0] ss:$8 sps:$4 sm:$0xff]  }
  0x35   : > { %965 = vmatprep.subr.bf16.mxu0 %v2795_v1  ;;  %2523 = vmatprep.subr.bf16.mxu1 %v2795_v1 }
  0x38   : > { %966 = vmatpush1.bf16.msra.mxu0 %v2613_v13  ;;  %2539 = vmatpush1.bf16.msra.mxu1 %v2613_v13  ;;  %v2709_v13 = vld [vmem:[%s2906_s24 + $0xf4] ss:$8 sps:$4 sm:$0xff]  }
  0x39   : > { %967 = vmatprep.subr.bf16.mxu0 %v2795_v1  ;;  %2524 = vmatprep.subr.bf16.mxu1 %v2795_v1 }
  0x3c   : > { %968 = vmatpush1.bf16.msra.mxu0 %v2614_v14  ;;  %2540 = vmatpush1.bf16.msra.mxu1 %v2614_v14  ;;  %v2711_v14 = vld [vmem:[%s2906_s24 + $0x1f4] ss:$8 sps:$4 sm:$0xff]  }
  0x3d   : > { %969 = vmatprep.subr.bf16.mxu0 %v2795_v1  ;;  %2525 = vmatprep.subr.bf16.mxu1 %v2795_v1 }
  0x40   : > { %970 = vmatpush1.bf16.msra.mxu0 %v2615_v15  ;;  %2541 = vmatpush1.bf16.msra.mxu1 %v2615_v15  ;;  %v2713_v15 = vld [vmem:[%s2906_s24 + $0xf0] ss:$8 sps:$4 sm:$0xff]  }
  0x41   : > { %971 = vmatprep.subr.bf16.mxu0 %v2795_v1  ;;  %2526 = vmatprep.subr.bf16.mxu1 %v2795_v1 }
  0x44   : > { %972 = vmatpush1.bf16.msra.mxu0 %v2616_v16  ;;  %2542 = vmatpush1.bf16.msra.mxu1 %v2616_v16  ;;  %v2714_v16 = vld [vmem:[%s2906_s24 + $0x1f0] ss:$8 sps:$4 sm:$0xff]  }
  0x45   : > { %973 = vmatprep.subr.bf16.mxu0 %v2795_v1  ;;  %2527 = vmatprep.subr.bf16.mxu1 %v2795_v1 }
  0x48   : > { %974 = vmatpush1.bf16.msra.mxu0 %v2617_v17  ;;  %2543 = vmatpush1.bf16.msra.mxu1 %v2617_v17  ;;  %v3032_v17 = vld [vmem:[%s3263_s2] ss:$0 sm:$0xff] }
  0x49   : > { %975 = vmatprep.subr.bf16.mxu0 %v2795_v1  ;;  %2528 = vmatprep.subr.bf16.mxu1 %v2795_v1  ;;  %v2691_v1 = vld [vmem:[%s2906_s24 + $0xc4] ss:$8 sps:$4 sm:$0xff]   ;;  %s269_s24 = sand.u32 1, %s2777_s16  }
  0x4a   : > { %s2101_s13 = sshll.u32 %s269_s24, 8  ;;  %s3215_s18 = scalar_lea.sflag [#allocation4], %s269_s24 }
  0x4b   : > { %s3052_s14 = scalar_lea.vmem [#allocation3], %s2101_s13 }
  0x4c   : > { %976 = vmatpush1.bf16.msra.mxu0 %v2618_v18  ;;  %2544 = vmatpush1.bf16.msra.mxu1 %v2618_v18  ;;  %s1970_s22 = sshll.u32 %s3052_s14, 4  ;;  %s3209_s22 = int_to_ptr.vmem [resolvable:$true] %s1970_s22 }
  0x4d   : > { %s2715_s5 = scalar_lea.vmem %s3209_s22, 4096  ;;  %p2722_p1 = scmp.lt.s32.totalorder %s3209_s22, %s2720_s7 }
  0x4e   : > { %p2716_p12 = scmp.ne.s32.totalorder %s3209_s22, %s2715_s5  ;;  %p2723_p2 = scmp.lt.s32.totalorder %s2721_s8, %s2715_s5 }
  0x4f   : > { %978 = vmatmul.mubr.bf16.vlgmr.msra.gmra.mrb[0].mxu0 %v2619_v19  ;;  %1106 = vmatmul.mubr.bf16.vlgmr.msra.gmra.mrb[0].mxu1 %v2622_v20  ;;  %v3037_v19 = vld [vmem:[%s3264_s3] ss:$0 sm:$0xff] }
  0x50   : > { %985 = vmatprep.mubr.bf16.mxu0 %v2625_v21  ;;  %1113 = vmatprep.mubr.bf16.mxu1 %v2627_v22  ;;  %p2717_p13 = pnand %p2716_p12, %p2864_p4  ;;  %p2724_p3 = por %p2723_p2, %p2722_p1 }
  0x52   : > { %p2718_p0 = pneg %p2717_p13 }
  0x54   : > { %p2725_p5 = pnand %p2724_p3, %p2718_p0 }
  0x57   : > { %986 = vmatmul.mubr.bf16.gmra.mrb[4].mxu0 %v2629_v23  ;;  %1114 = vmatmul.mubr.bf16.gmra.mrb[4].mxu1 %v2630_v24 }
  0x58   : > { %993 = vmatprep.mubr.bf16.mxu0 %v2631_v25  ;;  %1121 = vmatprep.mubr.bf16.mxu1 %v2633_v26 }
  0x5f   : > { %994 = vmatmul.mubr.bf16.gmra.mrb[8].mxu0 %v2635_v27  ;;  %1122 = vmatmul.mubr.bf16.gmra.mrb[8].mxu1 %v2636_v28 }
  0x60   : > { %1001 = vmatprep.mubr.bf16.mxu0 %v2637_v29  ;;  %1129 = vmatprep.mubr.bf16.mxu1 %v2639_v30 }
  0x67   : > { %1002 = vmatmul.mubr.bf16.gmra.mrb[12].mxu0 %v2641_v31  ;;  %1130 = vmatmul.mubr.bf16.gmra.mrb[12].mxu1 %v2642_v32 }
  0x68   : > { %1009 = vmatprep.mubr.bf16.mxu0 %v2643_v33  ;;  %1137 = vmatprep.mubr.bf16.mxu1 %v2645_v34 }
  0x6f   : > { %1010 = vmatmul.mubr.bf16.gmra.mrb[16].mxu0 %v2647_v35  ;;  %1138 = vmatmul.mubr.bf16.gmra.mrb[16].mxu1 %v2648_v36 }
  0x70   : > { %1017 = vmatprep.mubr.bf16.mxu0 %v2649_v37  ;;  %1145 = vmatprep.mubr.bf16.mxu1 %v2651_v38 }
  0x77   : > { %1018 = vmatmul.mubr.bf16.gmra.mrb[20].mxu0 %v2653_v39  ;;  %1146 = vmatmul.mubr.bf16.gmra.mrb[20].mxu1 %v2654_v40 }
  0x78   : > { %1025 = vmatprep.mubr.bf16.mxu0 %v2655_v41  ;;  %1153 = vmatprep.mubr.bf16.mxu1 %v2657_v42 }
  0x7f   : > { %1026 = vmatmul.mubr.bf16.gmra.mrb[24].mxu0 %v2659_v43  ;;  %1154 = vmatmul.mubr.bf16.gmra.mrb[24].mxu1 %v2660_v44 }
  0x80   : > { %1033 = vmatprep.mubr.bf16.mxu0 %v2661_v45  ;;  %1161 = vmatprep.mubr.bf16.mxu1 %v2663_v46 }
  0x87   : > { %1034 = vmatmul.mubr.bf16.gmra.mrb[28].mxu0 %v2665_v47  ;;  %1162 = vmatmul.mubr.bf16.gmra.mrb[28].mxu1 %v2666_v48 }
  0x88   : > { %1041 = vmatprep.mubr.bf16.mxu0 %v2667_v49  ;;  %1169 = vmatprep.mubr.bf16.mxu1 %v2669_v50 }
  0x8f   : > { %1042 = vmatmul.mubr.bf16.gmra.mrb[32].mxu0 %v2671_v51  ;;  %1170 = vmatmul.mubr.bf16.gmra.mrb[32].mxu1 %v2672_v52 }
  0x90   : > { %1049 = vmatprep.mubr.bf16.mxu0 %v2673_v53  ;;  %1177 = vmatprep.mubr.bf16.mxu1 %v2675_v54 }
  0x97   : > { %1050 = vmatmul.mubr.bf16.gmra.mrb[36].mxu0 %v2677_v55  ;;  %1178 = vmatmul.mubr.bf16.gmra.mrb[36].mxu1 %v2678_v56 }
  0x98   : > { %1057 = vmatprep.mubr.bf16.mxu0 %v2679_v57  ;;  %1185 = vmatprep.mubr.bf16.mxu1 %v2681_v58 }
  0x9f   : > { %1058 = vmatmul.mubr.bf16.gmra.mrb[40].mxu0 %v2683_v59  ;;  %1186 = vmatmul.mubr.bf16.gmra.mrb[40].mxu1 %v2684_v60 }
  0xa0   : > { %1065 = vmatprep.mubr.bf16.mxu0 %v2685_v61  ;;  %1193 = vmatprep.mubr.bf16.mxu1 %v2687_v62 }
  0xa7   : > { %1066 = vmatmul.mubr.bf16.gmra.mrb[44].mxu0 %v2689_v63  ;;  %1194 = vmatmul.mubr.bf16.gmra.mrb[44].mxu1 %v2690_v0 }
  0xa8   : > { %1073 = vmatprep.mubr.bf16.mxu0 %v2691_v1  ;;  %1201 = vmatprep.mubr.bf16.mxu1 %v2693_v2 }
  0xaf   : > { %1074 = vmatmul.mubr.bf16.gmra.mrb[48].mxu0 %v2695_v3  ;;  %1202 = vmatmul.mubr.bf16.gmra.mrb[48].mxu1 %v2696_v4 }
  0xb0   : > { %1081 = vmatprep.mubr.bf16.mxu0 %v2697_v5  ;;  %1209 = vmatprep.mubr.bf16.mxu1 %v2699_v6 }
  0xb7   : > { %1082 = vmatmul.mubr.bf16.gmra.mrb[52].mxu0 %v2701_v7  ;;  %1210 = vmatmul.mubr.bf16.gmra.mrb[52].mxu1 %v2702_v8 }
  0xb8   : > { %1089 = vmatprep.mubr.bf16.mxu0 %v2703_v9  ;;  %1217 = vmatprep.mubr.bf16.mxu1 %v2705_v10 }
  0xbf   : > { %1090 = vmatmul.mubr.bf16.gmra.mrb[56].mxu0 %v2707_v11  ;;  %1218 = vmatmul.mubr.bf16.gmra.mrb[56].mxu1 %v2708_v12 }
  0xc0   : > { %1097 = vmatprep.mubr.bf16.mxu0 %v2709_v13  ;;  %1225 = vmatprep.mubr.bf16.mxu1 %v2711_v14 }
  0xc7   : > { %1098 = vmatmul.mubr.bf16.gmra.mrb[60].mxu0 %v2713_v15  ;;  %1226 = vmatmul.mubr.bf16.gmra.mrb[60].mxu1 %v2714_v16 }
 0x122   : > { %v979_v18 = vpop.f32.mrb[0].mxu0  ;;  %v1107_v20 = vpop.f32.mrb[0].mxu1 }
 0x123   : > { %v1436_v21 = vmul.f32 %v3032_v17, %v979_v18  ;;  %v1468_v22 = vmul.f32 %v3032_v17, %v1107_v20  ;;  %v981_v23 = vpop.f32.mrb[1].mxu0  ;;  %v1109_v24 = vpop.f32.mrb[1].mxu1 }
 0x124   : > { %v982_v25 = vpop.f32.mrb[2].mxu0  ;;  %v1110_v26 = vpop.f32.mrb[2].mxu1 }
 0x125   : > { %v1507_v27 = vadd.f32 %v3037_v19, %v1436_v21  ;;  %v1539_v28 = vadd.f32 %v3037_v19, %v1468_v22  ;;  %v1437_v29 = vmul.f32 %v3032_v17, %v982_v25  ;;  %v1469_v30 = vmul.f32 %v3032_v17, %v1110_v26  ;;  %v984_v31 = vpop.f32.mrb[3].mxu0  ;;  %v1112_v32 = vpop.f32.mrb[3].mxu1 }
 0x127   : > { %v1508_v33 = vadd.f32 %v3037_v19, %v1437_v29  ;;  %v1540_v34 = vadd.f32 %v3037_v19, %v1469_v30  ;;  %v1571_v35 = vmax.f32 %v1507_v27, 0.0  ;;  %v1603_v36 = vmax.f32 %v1539_v28, 0.0 }
 0x129   : > { %v1572_v37 = vmax.f32 %v1508_v33, 0.0  ;;  %v1604_v38 = vmax.f32 %v1540_v34, 0.0 }
 0x12a   : > { %v987_v39 = vpop.f32.mrb[4].mxu0  ;;  %v1115_v40 = vpop.f32.mrb[4].mxu1 }
 0x12b   : > { %v2325_v41 = vpack.c.bf16 %v1572_v37, %v1571_v35  ;;  %v2405_v42 = vpack.c.bf16 %v1604_v38, %v1603_v36  ;;  %v1438_v43 = vmul.f32 %v3032_v17, %v987_v39  ;;  %v1470_v44 = vmul.f32 %v3032_v17, %v1115_v40  ;;  %v989_v45 = vpop.f32.mrb[5].mxu0  ;;  %v1117_v46 = vpop.f32.mrb[5].mxu1 }
 0x12c   : > { %v990_v47 = vpop.f32.mrb[6].mxu0  ;;  %v1118_v48 = vpop.f32.mrb[6].mxu1 }
 0x12d   : > { %2326 = vst [vmem:[%s3052_s14] sm:$0xff] %v2325_v41   ;;  %2497 = vst [vmem:[%s3052_s14 + $0x80] sm:$0xff] %v2405_v42   ;;  %v1509_v49 = vadd.f32 %v3037_v19, %v1438_v43  ;;  %v1541_v50 = vadd.f32 %v3037_v19, %v1470_v44  ;;  %v1439_v51 = vmul.f32 %v3032_v17, %v990_v47  ;;  %v992_v53 = vpop.f32.mrb[7].mxu0  ;;  %v1120_v54 = vpop.f32.mrb[7].mxu1 }
 0x12e   : > { %v1471_v52 = vmul.f32 %v3032_v17, %v1118_v48 }
 0x12f   : > { %v1510_v55 = vadd.f32 %v3037_v19, %v1439_v51  ;;  %v1573_v57 = vmax.f32 %v1509_v49, 0.0  ;;  %v1605_v58 = vmax.f32 %v1541_v50, 0.0 }
 0x130   : > { %v1542_v56 = vadd.f32 %v3037_v19, %v1471_v52 }
 0x131   : > { %v1574_v59 = vmax.f32 %v1510_v55, 0.0 }
 0x132   : > { %v1606_v60 = vmax.f32 %v1542_v56, 0.0  ;;  %v995_v61 = vpop.f32.mrb[8].mxu0  ;;  %v1123_v62 = vpop.f32.mrb[8].mxu1 }
 0x133   : > { %v2330_v63 = vpack.c.bf16 %v1574_v59, %v1573_v57  ;;  %v1440_v1 = vmul.f32 %v3032_v17, %v995_v61  ;;  %v1472_v2 = vmul.f32 %v3032_v17, %v1123_v62  ;;  %v997_v3 = vpop.f32.mrb[9].mxu0  ;;  %v1125_v4 = vpop.f32.mrb[9].mxu1 }
 0x134   : > { %v2410_v0 = vpack.c.bf16 %v1606_v60, %v1605_v58  ;;  %v998_v5 = vpop.f32.mrb[10].mxu0  ;;  %v1126_v6 = vpop.f32.mrb[10].mxu1 }
 0x135   : > { %2482 = vst [vmem:[%s3052_s14 + $0x8] sm:$0xff] %v2330_v63   ;;  %v1511_v7 = vadd.f32 %v3037_v19, %v1440_v1  ;;  %v1543_v8 = vadd.f32 %v3037_v19, %v1472_v2  ;;  %v1441_v9 = vmul.f32 %v3032_v17, %v998_v5  ;;  %v1473_v10 = vmul.f32 %v3032_v17, %v1126_v6  ;;  %v1000_v11 = vpop.f32.mrb[11].mxu0  ;;  %v1128_v12 = vpop.f32.mrb[11].mxu1 }
 0x136   : > { %2498 = vst [vmem:[%s3052_s14 + $0x88] sm:$0xff] %v2410_v0  }
 0x137   : > { %v1512_v13 = vadd.f32 %v3037_v19, %v1441_v9  ;;  %v1544_v14 = vadd.f32 %v3037_v19, %v1473_v10  ;;  %v1575_v15 = vmax.f32 %v1511_v7, 0.0  ;;  %v1607_v16 = vmax.f32 %v1543_v8, 0.0 }
 0x139   : > { %v1576_v18 = vmax.f32 %v1512_v13, 0.0  ;;  %v1608_v20 = vmax.f32 %v1544_v14, 0.0 }
 0x13a   : > { %v1003_v21 = vpop.f32.mrb[12].mxu0  ;;  %v1131_v22 = vpop.f32.mrb[12].mxu1 }
 0x13b   : > { %v2335_v23 = vpack.c.bf16 %v1576_v18, %v1575_v15  ;;  %v2415_v24 = vpack.c.bf16 %v1608_v20, %v1607_v16  ;;  %v1442_v25 = vmul.f32 %v3032_v17, %v1003_v21  ;;  %v1474_v26 = vmul.f32 %v3032_v17, %v1131_v22  ;;  %v1005_v27 = vpop.f32.mrb[13].mxu0  ;;  %v1133_v28 = vpop.f32.mrb[13].mxu1 }
 0x13c   : > { %v1006_v29 = vpop.f32.mrb[14].mxu0  ;;  %v1134_v30 = vpop.f32.mrb[14].mxu1 }
 0x13d   : > { %2483 = vst [vmem:[%s3052_s14 + $0x10] sm:$0xff] %v2335_v23   ;;  %2499 = vst [vmem:[%s3052_s14 + $0x90] sm:$0xff] %v2415_v24   ;;  %v1513_v31 = vadd.f32 %v3037_v19, %v1442_v25  ;;  %v1545_v32 = vadd.f32 %v3037_v19, %v1474_v26  ;;  %v1443_v33 = vmul.f32 %v3032_v17, %v1006_v29  ;;  %v1008_v35 = vpop.f32.mrb[15].mxu0  ;;  %v1136_v36 = vpop.f32.mrb[15].mxu1 }
 0x13e   : > { %v1475_v34 = vmul.f32 %v3032_v17, %v1134_v30 }
 0x13f   : > { %v1514_v37 = vadd.f32 %v3037_v19, %v1443_v33  ;;  %v1577_v39 = vmax.f32 %v1513_v31, 0.0  ;;  %v1609_v40 = vmax.f32 %v1545_v32, 0.0 }
 0x140   : > { %v1546_v38 = vadd.f32 %v3037_v19, %v1475_v34 }
 0x141   : > { %v1578_v41 = vmax.f32 %v1514_v37, 0.0 }
 0x142   : > { %v1610_v42 = vmax.f32 %v1546_v38, 0.0  ;;  %v1011_v43 = vpop.f32.mrb[16].mxu0  ;;  %v1139_v44 = vpop.f32.mrb[16].mxu1 }
 0x143   : > { %v2340_v45 = vpack.c.bf16 %v1578_v41, %v1577_v39  ;;  %v1444_v47 = vmul.f32 %v3032_v17, %v1011_v43  ;;  %v1476_v48 = vmul.f32 %v3032_v17, %v1139_v44  ;;  %v1013_v49 = vpop.f32.mrb[17].mxu0  ;;  %v1141_v50 = vpop.f32.mrb[17].mxu1 }
 0x144   : > { %v2420_v46 = vpack.c.bf16 %v1610_v42, %v1609_v40  ;;  %v1014_v51 = vpop.f32.mrb[18].mxu0  ;;  %v1142_v52 = vpop.f32.mrb[18].mxu1 }
 0x145   : > { %2484 = vst [vmem:[%s3052_s14 + $0x18] sm:$0xff] %v2340_v45   ;;  %v1515_v53 = vadd.f32 %v3037_v19, %v1444_v47  ;;  %v1547_v54 = vadd.f32 %v3037_v19, %v1476_v48  ;;  %v1445_v55 = vmul.f32 %v3032_v17, %v1014_v51  ;;  %v1477_v56 = vmul.f32 %v3032_v17, %v1142_v52  ;;  %v1016_v57 = vpop.f32.mrb[19].mxu0  ;;  %v1144_v58 = vpop.f32.mrb[19].mxu1 }
 0x146   : > { %2500 = vst [vmem:[%s3052_s14 + $0x98] sm:$0xff] %v2420_v46  }
 0x147   : > { %v1516_v59 = vadd.f32 %v3037_v19, %v1445_v55  ;;  %v1548_v60 = vadd.f32 %v3037_v19, %v1477_v56  ;;  %v1579_v61 = vmax.f32 %v1515_v53, 0.0  ;;  %v1611_v62 = vmax.f32 %v1547_v54, 0.0 }
 0x149   : > { %v1580_v63 = vmax.f32 %v1516_v59, 0.0  ;;  %v1612_v0 = vmax.f32 %v1548_v60, 0.0 }
 0x14a   : > { %v1019_v1 = vpop.f32.mrb[20].mxu0  ;;  %v1147_v2 = vpop.f32.mrb[20].mxu1 }
 0x14b   : > { %v2345_v3 = vpack.c.bf16 %v1580_v63, %v1579_v61  ;;  %v2425_v4 = vpack.c.bf16 %v1612_v0, %v1611_v62  ;;  %v1446_v5 = vmul.f32 %v3032_v17, %v1019_v1  ;;  %v1478_v6 = vmul.f32 %v3032_v17, %v1147_v2  ;;  %v1021_v7 = vpop.f32.mrb[21].mxu0  ;;  %v1149_v8 = vpop.f32.mrb[21].mxu1 }
 0x14c   : > { %v1022_v9 = vpop.f32.mrb[22].mxu0  ;;  %v1150_v10 = vpop.f32.mrb[22].mxu1 }
 0x14d   : > { %2485 = vst [vmem:[%s3052_s14 + $0x20] sm:$0xff] %v2345_v3   ;;  %2501 = vst [vmem:[%s3052_s14 + $0xa0] sm:$0xff] %v2425_v4   ;;  %v1517_v11 = vadd.f32 %v3037_v19, %v1446_v5  ;;  %v1549_v12 = vadd.f32 %v3037_v19, %v1478_v6  ;;  %v1447_v13 = vmul.f32 %v3032_v17, %v1022_v9  ;;  %v1024_v15 = vpop.f32.mrb[23].mxu0  ;;  %v1152_v16 = vpop.f32.mrb[23].mxu1 }
 0x14e   : > { %v1479_v14 = vmul.f32 %v3032_v17, %v1150_v10 }
 0x14f   : > { %v1518_v18 = vadd.f32 %v3037_v19, %v1447_v13  ;;  %v1581_v21 = vmax.f32 %v1517_v11, 0.0  ;;  %v1613_v22 = vmax.f32 %v1549_v12, 0.0 }
 0x150   : > { %v1550_v20 = vadd.f32 %v3037_v19, %v1479_v14 }
 0x151   : > { %v1582_v23 = vmax.f32 %v1518_v18, 0.0 }
 0x152   : > { %v1614_v24 = vmax.f32 %v1550_v20, 0.0  ;;  %v1027_v25 = vpop.f32.mrb[24].mxu0  ;;  %v1155_v26 = vpop.f32.mrb[24].mxu1 }
 0x153   : > { %v2350_v27 = vpack.c.bf16 %v1582_v23, %v1581_v21  ;;  %v1448_v29 = vmul.f32 %v3032_v17, %v1027_v25  ;;  %v1480_v30 = vmul.f32 %v3032_v17, %v1155_v26  ;;  %v1029_v31 = vpop.f32.mrb[25].mxu0  ;;  %v1157_v32 = vpop.f32.mrb[25].mxu1 }
 0x154   : > { %v2430_v28 = vpack.c.bf16 %v1614_v24, %v1613_v22  ;;  %v1030_v33 = vpop.f32.mrb[26].mxu0  ;;  %v1158_v34 = vpop.f32.mrb[26].mxu1 }
 0x155   : > { %2486 = vst [vmem:[%s3052_s14 + $0x28] sm:$0xff] %v2350_v27   ;;  %v1519_v35 = vadd.f32 %v3037_v19, %v1448_v29  ;;  %v1551_v36 = vadd.f32 %v3037_v19, %v1480_v30  ;;  %v1449_v37 = vmul.f32 %v3032_v17, %v1030_v33  ;;  %v1481_v38 = vmul.f32 %v3032_v17, %v1158_v34  ;;  %v1032_v39 = vpop.f32.mrb[27].mxu0  ;;  %v1160_v40 = vpop.f32.mrb[27].mxu1 }
 0x156   : > { %2502 = vst [vmem:[%s3052_s14 + $0xa8] sm:$0xff] %v2430_v28  }
 0x157   : > { %v1520_v41 = vadd.f32 %v3037_v19, %v1449_v37  ;;  %v1552_v42 = vadd.f32 %v3037_v19, %v1481_v38  ;;  %v1583_v43 = vmax.f32 %v1519_v35, 0.0  ;;  %v1615_v44 = vmax.f32 %v1551_v36, 0.0 }
 0x159   : > { %v1584_v45 = vmax.f32 %v1520_v41, 0.0  ;;  %v1616_v46 = vmax.f32 %v1552_v42, 0.0 }
 0x15a   : > { %v1035_v47 = vpop.f32.mrb[28].mxu0  ;;  %v1163_v48 = vpop.f32.mrb[28].mxu1 }
 0x15b   : > { %v2355_v49 = vpack.c.bf16 %v1584_v45, %v1583_v43  ;;  %v2435_v50 = vpack.c.bf16 %v1616_v46, %v1615_v44  ;;  %v1450_v51 = vmul.f32 %v3032_v17, %v1035_v47  ;;  %v1482_v52 = vmul.f32 %v3032_v17, %v1163_v48  ;;  %v1037_v53 = vpop.f32.mrb[29].mxu0  ;;  %v1165_v54 = vpop.f32.mrb[29].mxu1 }
 0x15c   : > { %v1038_v55 = vpop.f32.mrb[30].mxu0  ;;  %v1166_v56 = vpop.f32.mrb[30].mxu1 }
 0x15d   : > { %2487 = vst [vmem:[%s3052_s14 + $0x30] sm:$0xff] %v2355_v49   ;;  %2503 = vst [vmem:[%s3052_s14 + $0xb0] sm:$0xff] %v2435_v50   ;;  %v1521_v57 = vadd.f32 %v3037_v19, %v1450_v51  ;;  %v1553_v58 = vadd.f32 %v3037_v19, %v1482_v52  ;;  %v1451_v59 = vmul.f32 %v3032_v17, %v1038_v55  ;;  %v1040_v61 = vpop.f32.mrb[31].mxu0  ;;  %v1168_v62 = vpop.f32.mrb[31].mxu1 }
 0x15e   : > { %v1483_v60 = vmul.f32 %v3032_v17, %v1166_v56 }
 0x15f   : > { %v1522_v63 = vadd.f32 %v3037_v19, %v1451_v59  ;;  %v1585_v1 = vmax.f32 %v1521_v57, 0.0  ;;  %v1617_v2 = vmax.f32 %v1553_v58, 0.0 }
 0x160   : > { %v1554_v0 = vadd.f32 %v3037_v19, %v1483_v60 }
 0x161   : > { %v1586_v3 = vmax.f32 %v1522_v63, 0.0 }
 0x162   : > { %v1618_v4 = vmax.f32 %v1554_v0, 0.0  ;;  %v1043_v5 = vpop.f32.mrb[32].mxu0  ;;  %v1171_v6 = vpop.f32.mrb[32].mxu1 }
 0x163   : > { %v2360_v7 = vpack.c.bf16 %v1586_v3, %v1585_v1  ;;  %v1452_v9 = vmul.f32 %v3032_v17, %v1043_v5  ;;  %v1484_v10 = vmul.f32 %v3032_v17, %v1171_v6  ;;  %v1045_v11 = vpop.f32.mrb[33].mxu0  ;;  %v1173_v12 = vpop.f32.mrb[33].mxu1 }
 0x164   : > { %v2440_v8 = vpack.c.bf16 %v1618_v4, %v1617_v2  ;;  %v1046_v13 = vpop.f32.mrb[34].mxu0  ;;  %v1174_v14 = vpop.f32.mrb[34].mxu1 }
 0x165   : > { %2488 = vst [vmem:[%s3052_s14 + $0x38] sm:$0xff] %v2360_v7   ;;  %v1523_v15 = vadd.f32 %v3037_v19, %v1452_v9  ;;  %v1555_v16 = vadd.f32 %v3037_v19, %v1484_v10  ;;  %v1453_v18 = vmul.f32 %v3032_v17, %v1046_v13  ;;  %v1485_v20 = vmul.f32 %v3032_v17, %v1174_v14  ;;  %v1048_v21 = vpop.f32.mrb[35].mxu0  ;;  %v1176_v22 = vpop.f32.mrb[35].mxu1 }
 0x166   : > { %2504 = vst [vmem:[%s3052_s14 + $0xb8] sm:$0xff] %v2440_v8  }
 0x167   : > { %v1524_v23 = vadd.f32 %v3037_v19, %v1453_v18  ;;  %v1556_v24 = vadd.f32 %v3037_v19, %v1485_v20  ;;  %v1587_v25 = vmax.f32 %v1523_v15, 0.0  ;;  %v1619_v26 = vmax.f32 %v1555_v16, 0.0 }
 0x169   : > { %v1588_v27 = vmax.f32 %v1524_v23, 0.0  ;;  %v1620_v28 = vmax.f32 %v1556_v24, 0.0 }
 0x16a   : > { %v1051_v29 = vpop.f32.mrb[36].mxu0  ;;  %v1179_v30 = vpop.f32.mrb[36].mxu1 }
 0x16b   : > { %v2365_v31 = vpack.c.bf16 %v1588_v27, %v1587_v25  ;;  %v2445_v32 = vpack.c.bf16 %v1620_v28, %v1619_v26  ;;  %v1454_v33 = vmul.f32 %v3032_v17, %v1051_v29  ;;  %v1486_v34 = vmul.f32 %v3032_v17, %v1179_v30  ;;  %v1053_v35 = vpop.f32.mrb[37].mxu0  ;;  %v1181_v36 = vpop.f32.mrb[37].mxu1 }
 0x16c   : > { %v1054_v37 = vpop.f32.mrb[38].mxu0  ;;  %v1182_v38 = vpop.f32.mrb[38].mxu1 }
 0x16d   : > { %2489 = vst [vmem:[%s3052_s14 + $0x40] sm:$0xff] %v2365_v31   ;;  %2505 = vst [vmem:[%s3052_s14 + $0xc0] sm:$0xff] %v2445_v32   ;;  %v1525_v39 = vadd.f32 %v3037_v19, %v1454_v33  ;;  %v1557_v40 = vadd.f32 %v3037_v19, %v1486_v34  ;;  %v1455_v41 = vmul.f32 %v3032_v17, %v1054_v37  ;;  %v1056_v43 = vpop.f32.mrb[39].mxu0  ;;  %v1184_v44 = vpop.f32.mrb[39].mxu1 }
 0x16e   : > { %v1487_v42 = vmul.f32 %v3032_v17, %v1182_v38 }
 0x16f   : > { %v1526_v45 = vadd.f32 %v3037_v19, %v1455_v41  ;;  %v1589_v47 = vmax.f32 %v1525_v39, 0.0  ;;  %v1621_v48 = vmax.f32 %v1557_v40, 0.0 }
 0x170   : > { %v1558_v46 = vadd.f32 %v3037_v19, %v1487_v42 }
 0x171   : > { %v1590_v49 = vmax.f32 %v1526_v45, 0.0 }
 0x172   : > { %v1622_v50 = vmax.f32 %v1558_v46, 0.0  ;;  %v1059_v51 = vpop.f32.mrb[40].mxu0  ;;  %v1187_v52 = vpop.f32.mrb[40].mxu1 }
 0x173   : > { %v2370_v53 = vpack.c.bf16 %v1590_v49, %v1589_v47  ;;  %v1456_v55 = vmul.f32 %v3032_v17, %v1059_v51  ;;  %v1488_v56 = vmul.f32 %v3032_v17, %v1187_v52  ;;  %v1061_v57 = vpop.f32.mrb[41].mxu0  ;;  %v1189_v58 = vpop.f32.mrb[41].mxu1 }
 0x174   : > { %v2450_v54 = vpack.c.bf16 %v1622_v50, %v1621_v48  ;;  %v1062_v59 = vpop.f32.mrb[42].mxu0  ;;  %v1190_v60 = vpop.f32.mrb[42].mxu1 }
 0x175   : > { %2490 = vst [vmem:[%s3052_s14 + $0x48] sm:$0xff] %v2370_v53   ;;  %v1527_v61 = vadd.f32 %v3037_v19, %v1456_v55  ;;  %v1559_v62 = vadd.f32 %v3037_v19, %v1488_v56  ;;  %v1457_v63 = vmul.f32 %v3032_v17, %v1062_v59  ;;  %v1489_v0 = vmul.f32 %v3032_v17, %v1190_v60  ;;  %v1064_v1 = vpop.f32.mrb[43].mxu0  ;;  %v1192_v2 = vpop.f32.mrb[43].mxu1 }
 0x176   : > { %2506 = vst [vmem:[%s3052_s14 + $0xc8] sm:$0xff] %v2450_v54  }
 0x177   : > { %v1528_v3 = vadd.f32 %v3037_v19, %v1457_v63  ;;  %v1560_v4 = vadd.f32 %v3037_v19, %v1489_v0  ;;  %v1591_v5 = vmax.f32 %v1527_v61, 0.0  ;;  %v1623_v6 = vmax.f32 %v1559_v62, 0.0 }
 0x179   : > { %v1592_v7 = vmax.f32 %v1528_v3, 0.0  ;;  %v1624_v8 = vmax.f32 %v1560_v4, 0.0 }
 0x17a   : > { %v1067_v9 = vpop.f32.mrb[44].mxu0  ;;  %v1195_v10 = vpop.f32.mrb[44].mxu1 }
 0x17b   : > { %v2375_v11 = vpack.c.bf16 %v1592_v7, %v1591_v5  ;;  %v2455_v12 = vpack.c.bf16 %v1624_v8, %v1623_v6  ;;  %v1458_v13 = vmul.f32 %v3032_v17, %v1067_v9  ;;  %v1490_v14 = vmul.f32 %v3032_v17, %v1195_v10  ;;  %v1069_v15 = vpop.f32.mrb[45].mxu0  ;;  %v1197_v16 = vpop.f32.mrb[45].mxu1 }
 0x17c   : > { %v1070_v18 = vpop.f32.mrb[46].mxu0  ;;  %v1198_v20 = vpop.f32.mrb[46].mxu1 }
 0x17d   : > { %2491 = vst [vmem:[%s3052_s14 + $0x50] sm:$0xff] %v2375_v11   ;;  %2507 = vst [vmem:[%s3052_s14 + $0xd0] sm:$0xff] %v2455_v12   ;;  %v1529_v21 = vadd.f32 %v3037_v19, %v1458_v13  ;;  %v1561_v22 = vadd.f32 %v3037_v19, %v1490_v14  ;;  %v1459_v23 = vmul.f32 %v3032_v17, %v1070_v18  ;;  %v1072_v25 = vpop.f32.mrb[47].mxu0  ;;  %v1200_v26 = vpop.f32.mrb[47].mxu1 }
 0x17e   : > { %v1491_v24 = vmul.f32 %v3032_v17, %v1198_v20 }
 0x17f   : > { %v1530_v27 = vadd.f32 %v3037_v19, %v1459_v23  ;;  %v1593_v29 = vmax.f32 %v1529_v21, 0.0  ;;  %v1625_v30 = vmax.f32 %v1561_v22, 0.0 }
 0x180   : > { %v1562_v28 = vadd.f32 %v3037_v19, %v1491_v24 }
 0x181   : > { %v1594_v31 = vmax.f32 %v1530_v27, 0.0 }
 0x182   : > { %v1626_v32 = vmax.f32 %v1562_v28, 0.0  ;;  %v1075_v33 = vpop.f32.mrb[48].mxu0  ;;  %v1203_v34 = vpop.f32.mrb[48].mxu1 }
 0x183   : > { %v2380_v35 = vpack.c.bf16 %v1594_v31, %v1593_v29  ;;  %v1460_v37 = vmul.f32 %v3032_v17, %v1075_v33  ;;  %v1492_v38 = vmul.f32 %v3032_v17, %v1203_v34  ;;  %v1077_v39 = vpop.f32.mrb[49].mxu0  ;;  %v1205_v40 = vpop.f32.mrb[49].mxu1 }
 0x184   : > { %v2460_v36 = vpack.c.bf16 %v1626_v32, %v1625_v30  ;;  %v1078_v41 = vpop.f32.mrb[50].mxu0  ;;  %v1206_v42 = vpop.f32.mrb[50].mxu1 }
 0x185   : > { %2492 = vst [vmem:[%s3052_s14 + $0x58] sm:$0xff] %v2380_v35   ;;  %v1531_v43 = vadd.f32 %v3037_v19, %v1460_v37  ;;  %v1563_v44 = vadd.f32 %v3037_v19, %v1492_v38  ;;  %v1461_v45 = vmul.f32 %v3032_v17, %v1078_v41  ;;  %v1493_v46 = vmul.f32 %v3032_v17, %v1206_v42  ;;  %v1080_v47 = vpop.f32.mrb[51].mxu0  ;;  %v1208_v48 = vpop.f32.mrb[51].mxu1 }
 0x186   : > { %2508 = vst [vmem:[%s3052_s14 + $0xd8] sm:$0xff] %v2460_v36  }
 0x187   : > { %v1532_v49 = vadd.f32 %v3037_v19, %v1461_v45  ;;  %v1564_v50 = vadd.f32 %v3037_v19, %v1493_v46  ;;  %v1595_v51 = vmax.f32 %v1531_v43, 0.0  ;;  %v1627_v52 = vmax.f32 %v1563_v44, 0.0 }
 0x189   : > { %v1596_v53 = vmax.f32 %v1532_v49, 0.0  ;;  %v1628_v54 = vmax.f32 %v1564_v50, 0.0 }
 0x18a   : > { %v1083_v55 = vpop.f32.mrb[52].mxu0  ;;  %v1211_v56 = vpop.f32.mrb[52].mxu1 }
 0x18b   : > { %v2385_v57 = vpack.c.bf16 %v1596_v53, %v1595_v51  ;;  %v2465_v58 = vpack.c.bf16 %v1628_v54, %v1627_v52  ;;  %v1462_v59 = vmul.f32 %v3032_v17, %v1083_v55  ;;  %v1494_v60 = vmul.f32 %v3032_v17, %v1211_v56  ;;  %v1085_v61 = vpop.f32.mrb[53].mxu0  ;;  %v1213_v62 = vpop.f32.mrb[53].mxu1 }
 0x18c   : > { %v1086_v63 = vpop.f32.mrb[54].mxu0  ;;  %v1214_v0 = vpop.f32.mrb[54].mxu1 }
 0x18d   : > { %2493 = vst [vmem:[%s3052_s14 + $0x60] sm:$0xff] %v2385_v57   ;;  %2509 = vst [vmem:[%s3052_s14 + $0xe0] sm:$0xff] %v2465_v58   ;;  %v1533_v1 = vadd.f32 %v3037_v19, %v1462_v59  ;;  %v1565_v2 = vadd.f32 %v3037_v19, %v1494_v60  ;;  %v1463_v3 = vmul.f32 %v3032_v17, %v1086_v63  ;;  %v1088_v5 = vpop.f32.mrb[55].mxu0  ;;  %v1216_v6 = vpop.f32.mrb[55].mxu1 }
 0x18e   : > { %v1495_v4 = vmul.f32 %v3032_v17, %v1214_v0 }
 0x18f   : > { %v1534_v7 = vadd.f32 %v3037_v19, %v1463_v3  ;;  %v1597_v9 = vmax.f32 %v1533_v1, 0.0  ;;  %v1629_v10 = vmax.f32 %v1565_v2, 0.0 }
 0x190   : > { %v1566_v8 = vadd.f32 %v3037_v19, %v1495_v4 }
 0x191   : > { %v1598_v11 = vmax.f32 %v1534_v7, 0.0 }
 0x192   : > { %v1630_v12 = vmax.f32 %v1566_v8, 0.0  ;;  %v1091_v13 = vpop.f32.mrb[56].mxu0  ;;  %v1219_v14 = vpop.f32.mrb[56].mxu1 }
 0x193   : > { %v2390_v15 = vpack.c.bf16 %v1598_v11, %v1597_v9  ;;  %v1464_v18 = vmul.f32 %v3032_v17, %v1091_v13  ;;  %v1496_v20 = vmul.f32 %v3032_v17, %v1219_v14  ;;  %v1093_v21 = vpop.f32.mrb[57].mxu0  ;;  %v1221_v22 = vpop.f32.mrb[57].mxu1 }
 0x194   : > { %v2470_v16 = vpack.c.bf16 %v1630_v12, %v1629_v10  ;;  %v1094_v23 = vpop.f32.mrb[58].mxu0  ;;  %v1222_v24 = vpop.f32.mrb[58].mxu1 }
 0x195   : > { %2494 = vst [vmem:[%s3052_s14 + $0x68] sm:$0xff] %v2390_v15   ;;  %v1535_v25 = vadd.f32 %v3037_v19, %v1464_v18  ;;  %v1567_v26 = vadd.f32 %v3037_v19, %v1496_v20  ;;  %v1465_v27 = vmul.f32 %v3032_v17, %v1094_v23  ;;  %v1497_v28 = vmul.f32 %v3032_v17, %v1222_v24  ;;  %v1096_v29 = vpop.f32.mrb[59].mxu0  ;;  %v1224_v30 = vpop.f32.mrb[59].mxu1 }
 0x196   : > { %2510 = vst [vmem:[%s3052_s14 + $0xe8] sm:$0xff] %v2470_v16  }
 0x197   : > { %v1536_v31 = vadd.f32 %v3037_v19, %v1465_v27  ;;  %v1568_v32 = vadd.f32 %v3037_v19, %v1497_v28  ;;  %v1599_v33 = vmax.f32 %v1535_v25, 0.0  ;;  %v1631_v34 = vmax.f32 %v1567_v26, 0.0 }
 0x199   : > { %v1600_v35 = vmax.f32 %v1536_v31, 0.0  ;;  %v1632_v36 = vmax.f32 %v1568_v32, 0.0 }
 0x19a   : > { %v1099_v37 = vpop.f32.mrb[60].mxu0  ;;  %v1227_v38 = vpop.f32.mrb[60].mxu1 }
 0x19b   : > { %v2395_v39 = vpack.c.bf16 %v1600_v35, %v1599_v33  ;;  %v2475_v40 = vpack.c.bf16 %v1632_v36, %v1631_v34  ;;  %v1466_v41 = vmul.f32 %v3032_v17, %v1099_v37  ;;  %v1498_v42 = vmul.f32 %v3032_v17, %v1227_v38  ;;  %v1101_v43 = vpop.f32.mrb[61].mxu0  ;;  %v1229_v44 = vpop.f32.mrb[61].mxu1 }
 0x19c   : > { %v1102_v45 = vpop.f32.mrb[62].mxu0  ;;  %v1230_v46 = vpop.f32.mrb[62].mxu1 }
 0x19d   : > { %2495 = vst [vmem:[%s3052_s14 + $0x70] sm:$0xff] %v2395_v39   ;;  %2511 = vst [vmem:[%s3052_s14 + $0xf0] sm:$0xff] %v2475_v40   ;;  %v1537_v47 = vadd.f32 %v3037_v19, %v1466_v41  ;;  %v1569_v48 = vadd.f32 %v3037_v19, %v1498_v42  ;;  %v1467_v49 = vmul.f32 %v3032_v17, %v1102_v45  ;;  %v1104_v51 = vpop.f32.mrb[63].mxu0  ;;  %v1232_v52 = vpop.f32.mrb[63].mxu1 }
 0x19e   : > { %v1499_v50 = vmul.f32 %v3032_v17, %v1230_v46 }
 0x19f   : > { %v1538_v53 = vadd.f32 %v3037_v19, %v1467_v49  ;;  %v1601_v55 = vmax.f32 %v1537_v47, 0.0  ;;  %v1633_v56 = vmax.f32 %v1569_v48, 0.0 }
 0x1a0   : > { %v1570_v54 = vadd.f32 %v3037_v19, %v1499_v50 }
 0x1a1   : > { %v1602_v57 = vmax.f32 %v1538_v53, 0.0 }
 0x1a2   : > { %v1634_v58 = vmax.f32 %v1570_v54, 0.0 }
 0x1a3   : > { %v2400_v17 = vpack.c.bf16 %v1602_v57, %v1601_v55 }
 0x1a4   : > { %v2480_v59 = vpack.c.bf16 %v1634_v58, %v1633_v56 }
 0x1a5   : > { %2496 = vst [vmem:[%s3052_s14 + $0x78] sm:$0xff] %v2400_v17  }
 0x1a6   : > { %2512 = vst [vmem:[%s3052_s14 + $0xf8] sm:$0xff] %v2480_v59  }
 0x1a7   : > { %2728 = shalt.err (!%p2725_p5)
}
 0x1a8   : > { %s2729_s9 = scalar_lea.hbm %s3207_s30, 4096  ;;  %s2733_s12 = scalar_lea.hbm %s3265_s4, 16384 }
 0x1a9   : > { %p2730_p6 = scmp.ne.s32.totalorder %s3207_s30, %s2729_s9  ;;  %p2734_p10 = scmp.lt.u32.totalorder %s3207_s30, %s3265_s4 }
 0x1aa   : > { %p2735_p11 = scmp.lt.u32.totalorder %s2733_s12, %s2729_s9  ;;  %p2737_p13 = scmp.lt.u32.totalorder %s2729_s9, %s3207_s30 }
 0x1ab   : > { %p2731_p7 = pnand %p2730_p6, %p2864_p4 }
 0x1ac   : > { %p2736_p12 = por %p2735_p11, %p2734_p10 }
 0x1ad   : > { %p2732_p9 = pneg %p2731_p7 }
 0x1ae   : > { %p2738_p0 = por %p2737_p13, %p2736_p12 }
 0x1b0   : > { %p2739_p1 = pnand %p2738_p0, %p2732_p9 }
 0x1b2   : > { %2742 = shalt.err (!%p2739_p1)
}
 0x1b3   : > { %s2797_s14 = smov 64   ;;  %s2798_s21 = smov 4  }
 0x1b4   : > { %2545 = dma.vmem_to_hbm [thread:$0]  (%p2864_p4), %s3209_s22, 4096, %s3207_s30, %s3215_s18, %s2797_s14, %s2797_s14, %s2798_s21  }
 0x1b5 PF: > { %p2551_p2 = scmp.ge.s32.totalorder %s2793_s20, 2  ;;  %s1985_s26 = sand.u32 1, %s2773_s15  }
 0x1b6   : > { %s1986_s29 = scalar_lea.sflag [#allocation4], %s1985_s26 }
 0x1b7   : > { %p2548_p3 = pnand %p2551_p2, %p2871_p8 }
 0x1b9   : > { %2768 = dma.done.wait (!%p2548_p3), %s1986_s29, 4096  }
 0x1ba   : > { %2770 = vsyncadd (!%p2548_p3), %s1986_s29, 4294963200  ;;  %s17_s20 = sadd.s32 1, %s2793_s20   ;;  %s3268_s15 = smov %s2777_s16 }
 0x1bb   : > { %p14_p5 = scmp.ge.s32.totalorder %s17_s20, 6   ;;  %s3269_s16 = smov %s2781_s17 }
 0x1bc   : > { %s3270_s17 = smov %s2877_s28  ;;  %s3271_s18 = smov %s2789_s19 }
 0x1bd   : > { %s3272_s19 = smov %s3274_s23  ;;  %16 = sbr.rel (!%p14_p5) target bundleno = 4 (0x4), region = 88 }
 0x1c4   :  { %1991 = vsyncpa [#allocation4], 1 }
 0x1c5   :  { %1993 = vsyncpa [#allocation4 + $0x1], 1 }

</bundles_post_ra>
